<compile_context>
chip_gen: v7x
topology: tpu7x:2x2x1
jax: 0.10.0
libtpu: 0.0.40
codegen_flags: <defaults>
</compile_context>

<pallas_src>
import functools

import jax
import jax.numpy as jnp
from jax.experimental import pallas as pl
from jax.experimental.pallas import tpu as pltpu


def _round_up(x, m):
    return ((x + m - 1) // m) * m


# ----------------------------------------------------------------------------
# Kernel 1: im2col'd conv tile as one MXU matmul, fused FrozenBN affine + ReLU.
# ----------------------------------------------------------------------------
def _conv_bn_relu_kernel(p_ref, w_ref, scale_ref, bias_ref, o_ref):
    # p_ref: (TM, K) bf16 patches, w_ref: (K, Cout) bf16,
    # scale/bias: (1, Cout) f32, o_ref: (TM, Cout) f32.
    acc = jnp.dot(p_ref[...], w_ref[...], preferred_element_type=jnp.float32)
    y = acc * scale_ref[...] + bias_ref[...]
    o_ref[...] = jnp.maximum(y, 0.0).astype(o_ref.dtype)


# ----------------------------------------------------------------------------
# Kernel 2: 3x3 / stride-2 / ceil_mode max-pool, one image per grid step.
# ----------------------------------------------------------------------------
def _maxpool_kernel(x_ref, o_ref, *, Ho, Wo, HP, WP):
    # x_ref: (1, Ho, Wo, C) post-ReLU conv output; o_ref: (1, HP, WP, C).
    HF = (Ho - 3) // 2 + 1      # output rows whose 3-tap window is fully in-bounds
    WF = (Wo - 3) // 2 + 1      # output cols whose 3-tap window is fully in-bounds

    def region_max(oi, oj, nh, nw, n_kh, n_kw):
        m = None
        for kh in range(n_kh):
            for kw in range(n_kw):
                slab = x_ref[:, pl.ds(2 * oi + kh, nh, stride=2),
                             pl.ds(2 * oj + kw, nw, stride=2), :]
                m = slab if m is None else jnp.maximum(m, slab)
        return m

    # Interior: full 3x3 windows -> 9 strided slabs, 8 VPU maxes, one dense store.
    o_ref[:, :HF, :WF, :] = region_max(0, 0, HF, WF, 3, 3)
    # ceil_mode ragged bottom row (only 2 valid row taps).
    if HP > HF:
        o_ref[:, HF:, :WF, :] = region_max(HF, 0, 1, WF, 2, 3)
    # ceil_mode ragged right column (only 2 valid col taps).
    if WP > WF:
        o_ref[:, :HF, WF:, :] = region_max(0, WF, HF, 1, 3, 2)
    # ceil_mode ragged corner.
    if HP > HF and WP > WF:
        o_ref[:, HF:, WF:, :] = region_max(HF, WF, 1, 1, 2, 2)


# ----------------------------------------------------------------------------
# Wrapper (glue: layout transposes, im2col patch extraction, tiling decisions)
# ----------------------------------------------------------------------------
def base_stem_forward(x_nchw, w_oihw, gamma, beta, running_mean, running_var,
                      eps=1e-5):
    N, Cin, H, W = x_nchw.shape
    Cout, _, KH, KW = w_oihw.shape
    stride, pad = 2, 3

    Ho = (H + 2 * pad - KH) // stride + 1
    Wo = (W + 2 * pad - KW) // stride + 1
    assert Ho >= 3 and Wo >= 3, "stem maxpool (k=3, s=2, ceil_mode) needs conv output >= 3x3"

    # ---- im2col in bf16 (streamed tile-by-tile by the conv kernel) ----
    x = jnp.transpose(x_nchw, (0, 2, 3, 1)).astype(jnp.bfloat16)          # NCHW -> NHWC
    xp = jnp.pad(x, ((0, 0), (pad, pad), (pad, pad), (0, 0)))
    parts = []
    for kh in range(KH):
        for kw in range(KW):
            parts.append(xp[:, kh:kh + stride * Ho:stride,
                            kw:kw + stride * Wo:stride, :])
    K = KH * KW * Cin
    M = N * Ho * Wo
    patches2d = jnp.concatenate(parts, axis=-1).reshape(M, K)             # (M, K) bf16

    # Weight (Cout, Cin, KH, KW) -> (KH, KW, Cin, Cout) -> (K, Cout), matching patch order.
    w_mat = jnp.transpose(w_oihw, (2, 3, 1, 0)).reshape(K, Cout).astype(jnp.bfloat16)

    # Frozen BatchNorm folded into a per-channel affine (f32 epilogue).
    scale = (gamma * jax.lax.rsqrt(running_var + eps)).astype(jnp.float32)
    bias = (beta - running_mean * scale).astype(jnp.float32)
    scale2d = scale.reshape(1, Cout)
    bias2d = bias.reshape(1, Cout)

    # ---- Kernel 1: tiled conv (as matmul) + BN + ReLU ----
    # TM sized so 2x(double-buffered) bf16 patch tile + f32 out tile stay far below the
    # 32 MiB scoped-VMEM budget common to v5e/v6e/v7x.
    TM = min(1024, _round_up(M, 8))
    grid_m = pl.cdiv(M, TM)
    cost = pl.CostEstimate(
        flops=2 * M * K * Cout,
        transcendentals=0,
        bytes_accessed=M * K * 2 + K * Cout * 2 + M * Cout * 4 + 2 * Cout * 4)

    y2d = pl.pallas_call(
        _conv_bn_relu_kernel,
        out_shape=jax.ShapeDtypeStruct((M, Cout), jnp.float32),
        grid=(grid_m,),
        in_specs=[
            pl.BlockSpec((TM, K), lambda m: (m, 0)),      # patches: streamed over M
            pl.BlockSpec((K, Cout), lambda m: (0, 0)),    # weights: resident
            pl.BlockSpec((1, Cout), lambda m: (0, 0)),    # BN scale
            pl.BlockSpec((1, Cout), lambda m: (0, 0)),    # BN bias
        ],
        out_specs=pl.BlockSpec((TM, Cout), lambda m: (m, 0)),
        compiler_params=pltpu.CompilerParams(
            dimension_semantics=("parallel",),
            vmem_limit_bytes=32 * 1024 * 1024),
        cost_estimate=cost,
    )(patches2d, w_mat, scale2d, bias2d)
    y = y2d.reshape(N, Ho, Wo, Cout)

    # ---- Kernel 2: max_pool2d(kernel_size=3, stride=2, ceil_mode=True), no padding ----
    HP = -(-(Ho - 3) // 2) + 1
    WP = -(-(Wo - 3) // 2) + 1
    out = pl.pallas_call(
        functools.partial(_maxpool_kernel, Ho=Ho, Wo=Wo, HP=HP, WP=WP),
        out_shape=jax.ShapeDtypeStruct((N, HP, WP, Cout), jnp.float32),
        grid=(N,),
        in_specs=[pl.BlockSpec((1, Ho, Wo, Cout), lambda n: (n, 0, 0, 0))],
        out_specs=pl.BlockSpec((1, HP, WP, Cout), lambda n: (n, 0, 0, 0)),
        compiler_params=pltpu.CompilerParams(dimension_semantics=("parallel",)),
    )(y)

    # NHWC -> NCHW (kept for PyTorch-interface fidelity; drop if downstream accepts NHWC).
    return jnp.transpose(out, (0, 3, 1, 2))


# ----------------------------------------------------------------------------
# Pure-JAX reference (for correctness check)
# ----------------------------------------------------------------------------
def base_stem_reference(x_nchw, w_oihw, gamma, beta, mean, var, eps=1e-5):
    y = jax.lax.conv_general_dilated(
        x_nchw.astype(jnp.float32), w_oihw.astype(jnp.float32),
        window_strides=(2, 2), padding=((3, 3), (3, 3)),
        dimension_numbers=("NCHW", "OIHW", "NCHW"),
        precision=jax.lax.Precision.HIGHEST)
    inv = jax.lax.rsqrt(var + eps)
    scale = (gamma * inv).reshape(1, -1, 1, 1)
    bias = (beta - mean * gamma * inv).reshape(1, -1, 1, 1)
    y = jnp.maximum(y * scale + bias, 0.0)
    _, _, Ho, Wo = y.shape

    def ceil_pad(L):
        P = -(-(L - 3) // 2) + 1
        return 2 * (P - 1) + 3 - L

    y = jax.lax.reduce_window(
        y, -jnp.inf, jax.lax.max,
        window_dimensions=(1, 1, 3, 3), window_strides=(1, 1, 2, 2),
        padding=((0, 0), (0, 0), (0, ceil_pad(Ho)), (0, ceil_pad(Wo))))
    return y


# ----------------------------------------------------------------------------
# Main
# ----------------------------------------------------------------------------
if __name__ == "__main__":
    key = jax.random.PRNGKey(0)
    k_x, k_w, k_g, k_b, k_m, k_v = jax.random.split(key, 6)

    N, Cin, H, W = 2, 3, 16, 16
    Cout, KH, KW = 64, 7, 7            # STEM_OUT_CHANNELS = 64

    x = jax.random.normal(k_x, (N, Cin, H, W), dtype=jnp.float32)

    # Conv weight: kaiming_uniform_(a=1) -> U(-sqrt(3/fan_in), sqrt(3/fan_in))
    fan_in = Cin * KH * KW
    bound = (3.0 / fan_in) ** 0.5
    w = jax.random.uniform(k_w, (Cout, Cin, KH, KW), jnp.float32, -bound, bound)

    # Frozen BN params (synthetic, deterministic)
    gamma = jax.random.uniform(k_g, (Cout,), jnp.float32, 0.5, 1.5)
    beta = jax.random.uniform(k_b, (Cout,), jnp.float32, -0.1, 0.1)
    mean = 0.1 * jax.random.normal(k_m, (Cout,), jnp.float32)
    var = jax.random.uniform(k_v, (Cout,), jnp.float32, 0.5, 1.5)

    out = jax.jit(base_stem_forward)(x, w, gamma, beta, mean, var)
    out = jax.block_until_ready(out)

    ref = base_stem_reference(x, w, gamma, beta, mean, var)
    assert out.shape == ref.shape, (out.shape, ref.shape)
    # bf16 MXU operands (f32 accumulation) => loosened tolerance vs the f32 reference.
    max_err = float(jnp.max(jnp.abs(out - ref)))
    assert jnp.allclose(out, ref, atol=5e-2, rtol=5e-2), max_err

    print("KERNEL_OK")
</pallas_src>

<mosaic_0001>
module attributes {stable_mosaic.version = 11 : i64} {
  func.func @_conv_bn_relu_kernel(%arg0: i32, %arg1: memref<128x147xbf16, #tpu.memory_space<vmem>>, %arg2: memref<147x64xbf16, #tpu.memory_space<vmem>>, %arg3: memref<1x64xf32, #tpu.memory_space<vmem>>, %arg4: memref<1x64xf32, #tpu.memory_space<vmem>>, %arg5: memref<128x64xf32, #tpu.memory_space<vmem>>) attributes {dimension_semantics = [#tpu.dimension_semantics<parallel>], iteration_bounds = array<i64: 1>, scalar_prefetch = 0 : i64, scratch_operands = 0 : i64, tpu.core_type = #tpu.core_type<tc>, window_params = [{transform_indices = @transform_0, window_bounds = array<i64: 128, 147>}, {pipeline_mode = #tpu.pipeline_mode<synchronous>, transform_indices = @transform_1, window_bounds = array<i64: 147, 64>}, {pipeline_mode = #tpu.pipeline_mode<synchronous>, transform_indices = @transform_2, window_bounds = array<i64: 1, 64>}, {pipeline_mode = #tpu.pipeline_mode<synchronous>, transform_indices = @transform_3, window_bounds = array<i64: 1, 64>}, {transform_indices = @transform_4, window_bounds = array<i64: 128, 64>}]} {
    %c0 = arith.constant 0 : index
    %c0_0 = arith.constant 0 : index
    %0 = vector.load %arg1[%c0, %c0_0] : memref<128x147xbf16, #tpu.memory_space<vmem>>, vector<128x147xbf16>
    %c0_1 = arith.constant 0 : index
    %c0_2 = arith.constant 0 : index
    %1 = vector.load %arg2[%c0_1, %c0_2] : memref<147x64xbf16, #tpu.memory_space<vmem>>, vector<147x64xbf16>
    %cst = arith.constant dense<0.000000e+00> : vector<128x64xf32>
    %2 = tpu.matmul %0, %1, %cst {dimension_numbers = #tpu.dot_dimension_numbers<[1], [0], [0], [1], [0, 0, 1, 1], [], []>} : vector<128x147xbf16>, vector<147x64xbf16>, vector<128x64xf32> -> vector<128x64xf32>
    %c0_3 = arith.constant 0 : index
    %c0_4 = arith.constant 0 : index
    %3 = vector.load %arg3[%c0_3, %c0_4] : memref<1x64xf32, #tpu.memory_space<vmem>>, vector<1x64xf32>
    %4 = vector.broadcast %3 : vector<1x64xf32> to vector<128x64xf32>
    %5 = arith.mulf %2, %4 : vector<128x64xf32>
    %c0_5 = arith.constant 0 : index
    %c0_6 = arith.constant 0 : index
    %6 = vector.load %arg4[%c0_5, %c0_6] : memref<1x64xf32, #tpu.memory_space<vmem>>, vector<1x64xf32>
    %7 = vector.broadcast %6 : vector<1x64xf32> to vector<128x64xf32>
    %8 = arith.addf %5, %7 : vector<128x64xf32>
    %cst_7 = arith.constant 0.000000e+00 : f32
    %9 = vector.broadcast %cst_7 : f32 to vector<128x64xf32>
    %10 = arith.maximumf %8, %9 : vector<128x64xf32>
    %c0_8 = arith.constant 0 : index
    %c0_9 = arith.constant 0 : index
    %11 = vector.load %arg5[%c0_8, %c0_9] : memref<128x64xf32, #tpu.memory_space<vmem>>, vector<128x64xf32>
    tpu.vector_store %arg5[%c0_8, %c0_9], %10 {strides = array<i32>} : memref<128x64xf32, #tpu.memory_space<vmem>>, vector<128x64xf32>,
    return
  }
  func.func @transform_0(%arg0: i32) -> (i32, i32) {
    %c0_i32 = arith.constant 0 : i32
    %c0_i32_0 = arith.constant 0 : i32
    return %arg0, %c0_i32 : i32, i32
  }
  func.func @transform_1(%arg0: i32) -> (i32, i32) {
    %c0_i32 = arith.constant 0 : i32
    %c0_i32_0 = arith.constant 0 : i32
    %c0_i32_1 = arith.constant 0 : i32
    return %c0_i32, %c0_i32_0 : i32, i32
  }
  func.func @transform_2(%arg0: i32) -> (i32, i32) {
    %c0_i32 = arith.constant 0 : i32
    %c0_i32_0 = arith.constant 0 : i32
    %c0_i32_1 = arith.constant 0 : i32
    return %c0_i32, %c0_i32_0 : i32, i32
  }
  func.func @transform_3(%arg0: i32) -> (i32, i32) {
    %c0_i32 = arith.constant 0 : i32
    %c0_i32_0 = arith.constant 0 : i32
    %c0_i32_1 = arith.constant 0 : i32
    return %c0_i32, %c0_i32_0 : i32, i32
  }
  func.func @transform_4(%arg0: i32) -> (i32, i32) {
    %c0_i32 = arith.constant 0 : i32
    %c0_i32_0 = arith.constant 0 : i32
    return %arg0, %c0_i32 : i32, i32
  }
}

module attributes {stable_mosaic.version = 11 : i64} {
  func.func @_maxpool_kernel(%arg0: i32, %arg1: memref<1x8x8x64xf32, #tpu.memory_space<vmem>>, %arg2: memref<1x4x4x64xf32, #tpu.memory_space<vmem>>) attributes {dimension_semantics = [#tpu.dimension_semantics<parallel>], iteration_bounds = array<i64: 2>, scalar_prefetch = 0 : i64, scratch_operands = 0 : i64, tpu.core_type = #tpu.core_type<tc>, window_params = [{transform_indices = @transform_0, window_bounds = array<i64: 1, 8, 8, 64>}, {transform_indices = @transform_1, window_bounds = array<i64: 1, 4, 4, 64>}]} {
    %c0 = arith.constant 0 : index
    %c0_0 = arith.constant 0 : index
    %c0_1 = arith.constant 0 : index
    %c0_2 = arith.constant 0 : index
    %0 = tpu.strided_load %arg1[%c0, %c0_0, %c0_1, %c0_2] {strides = array<i32: 1, 2, 2, 1>} : memref<1x8x8x64xf32, #tpu.memory_space<vmem>>, vector<1x3x3x64xf32>
    %c0_3 = arith.constant 0 : index
    %c0_4 = arith.constant 0 : index
    %c1 = arith.constant 1 : index
    %c0_5 = arith.constant 0 : index
    %1 = tpu.strided_load %arg1[%c0_3, %c0_4, %c1, %c0_5] {strides = array<i32: 1, 2, 2, 1>} : memref<1x8x8x64xf32, #tpu.memory_space<vmem>>, vector<1x3x3x64xf32>
    %2 = arith.maximumf %0, %1 : vector<1x3x3x64xf32>
    %c0_6 = arith.constant 0 : index
    %c0_7 = arith.constant 0 : index
    %c2 = arith.constant 2 : index
    %c0_8 = arith.constant 0 : index
    %3 = tpu.strided_load %arg1[%c0_6, %c0_7, %c2, %c0_8] {strides = array<i32: 1, 2, 2, 1>} : memref<1x8x8x64xf32, #tpu.memory_space<vmem>>, vector<1x3x3x64xf32>
    %4 = arith.maximumf %2, %3 : vector<1x3x3x64xf32>
    %c0_9 = arith.constant 0 : index
    %c1_10 = arith.constant 1 : index
    %c0_11 = arith.constant 0 : index
    %c0_12 = arith.constant 0 : index
    %5 = tpu.strided_load %arg1[%c0_9, %c1_10, %c0_11, %c0_12] {strides = array<i32: 1, 2, 2, 1>} : memref<1x8x8x64xf32, #tpu.memory_space<vmem>>, vector<1x3x3x64xf32>
    %6 = arith.maximumf %4, %5 : vector<1x3x3x64xf32>
    %c0_13 = arith.constant 0 : index
    %c1_14 = arith.constant 1 : index
    %c1_15 = arith.constant 1 : index
    %c0_16 = arith.constant 0 : index
    %7 = tpu.strided_load %arg1[%c0_13, %c1_14, %c1_15, %c0_16] {strides = array<i32: 1, 2, 2, 1>} : memref<1x8x8x64xf32, #tpu.memory_space<vmem>>, vector<1x3x3x64xf32>
    %8 = arith.maximumf %6, %7 : vector<1x3x3x64xf32>
    %c0_17 = arith.constant 0 : index
    %c1_18 = arith.constant 1 : index
    %c2_19 = arith.constant 2 : index
    %c0_20 = arith.constant 0 : index
    %9 = tpu.strided_load %arg1[%c0_17, %c1_18, %c2_19, %c0_20] {strides = array<i32: 1, 2, 2, 1>} : memref<1x8x8x64xf32, #tpu.memory_space<vmem>>, vector<1x3x3x64xf32>
    %10 = arith.maximumf %8, %9 : vector<1x3x3x64xf32>
    %c0_21 = arith.constant 0 : index
    %c2_22 = arith.constant 2 : index
    %c0_23 = arith.constant 0 : index
    %c0_24 = arith.constant 0 : index
    %11 = tpu.strided_load %arg1[%c0_21, %c2_22, %c0_23, %c0_24] {strides = array<i32: 1, 2, 2, 1>} : memref<1x8x8x64xf32, #tpu.memory_space<vmem>>, vector<1x3x3x64xf32>
    %12 = arith.maximumf %10, %11 : vector<1x3x3x64xf32>
    %c0_25 = arith.constant 0 : index
    %c2_26 = arith.constant 2 : index
    %c1_27 = arith.constant 1 : index
    %c0_28 = arith.constant 0 : index
    %13 = tpu.strided_load %arg1[%c0_25, %c2_26, %c1_27, %c0_28] {strides = array<i32: 1, 2, 2, 1>} : memref<1x8x8x64xf32, #tpu.memory_space<vmem>>, vector<1x3x3x64xf32>
    %14 = arith.maximumf %12, %13 : vector<1x3x3x64xf32>
    %c0_29 = arith.constant 0 : index
    %c2_30 = arith.constant 2 : index
    %c2_31 = arith.constant 2 : index
    %c0_32 = arith.constant 0 : index
    %15 = tpu.strided_load %arg1[%c0_29, %c2_30, %c2_31, %c0_32] {strides = array<i32: 1, 2, 2, 1>} : memref<1x8x8x64xf32, #tpu.memory_space<vmem>>, vector<1x3x3x64xf32>
    %16 = arith.maximumf %14, %15 : vector<1x3x3x64xf32>
    %c0_33 = arith.constant 0 : index
    %c0_34 = arith.constant 0 : index
    %c0_35 = arith.constant 0 : index
    %c0_36 = arith.constant 0 : index
    %17 = vector.load %arg2[%c0_33, %c0_34, %c0_35, %c0_36] : memref<1x4x4x64xf32, #tpu.memory_space<vmem>>, vector<1x3x3x64xf32>
    tpu.vector_store %arg2[%c0_33, %c0_34, %c0_35, %c0_36], %16 {strides = array<i32>} : memref<1x4x4x64xf32, #tpu.memory_space<vmem>>, vector<1x3x3x64xf32>,
    %c0_37 = arith.constant 0 : index
    %c6 = arith.constant 6 : index
    %c0_38 = arith.constant 0 : index
    %c0_39 = arith.constant 0 : index
    %18 = tpu.strided_load %arg1[%c0_37, %c6, %c0_38, %c0_39] {strides = array<i32: 1, 2, 2, 1>} : memref<1x8x8x64xf32, #tpu.memory_space<vmem>>, vector<1x1x3x64xf32>
    %c0_40 = arith.constant 0 : index
    %c6_41 = arith.constant 6 : index
    %c1_42 = arith.constant 1 : index
    %c0_43 = arith.constant 0 : index
    %19 = tpu.strided_load %arg1[%c0_40, %c6_41, %c1_42, %c0_43] {strides = array<i32: 1, 2, 2, 1>} : memref<1x8x8x64xf32, #tpu.memory_space<vmem>>, vector<1x1x3x64xf32>
    %20 = arith.maximumf %18, %19 : vector<1x1x3x64xf32>
    %c0_44 = arith.constant 0 : index
    %c6_45 = arith.constant 6 : index
    %c2_46 = arith.constant 2 : index
    %c0_47 = arith.constant 0 : index
    %21 = tpu.strided_load %arg1[%c0_44, %c6_45, %c2_46, %c0_47] {strides = array<i32: 1, 2, 2, 1>} : memref<1x8x8x64xf32, #tpu.memory_space<vmem>>, vector<1x1x3x64xf32>
    %22 = arith.maximumf %20, %21 : vector<1x1x3x64xf32>
    %c0_48 = arith.constant 0 : index
    %c7 = arith.constant 7 : index
    %c0_49 = arith.constant 0 : index
    %c0_50 = arith.constant 0 : index
    %23 = tpu.strided_load %arg1[%c0_48, %c7, %c0_49, %c0_50] {strides = array<i32: 1, 2, 2, 1>} : memref<1x8x8x64xf32, #tpu.memory_space<vmem>>, vector<1x1x3x64xf32>
    %24 = arith.maximumf %22, %23 : vector<1x1x3x64xf32>
    %c0_51 = arith.constant 0 : index
    %c7_52 = arith.constant 7 : index
    %c1_53 = arith.constant 1 : index
    %c0_54 = arith.constant 0 : index
    %25 = tpu.strided_load %arg1[%c0_51, %c7_52, %c1_53, %c0_54] {strides = array<i32: 1, 2, 2, 1>} : memref<1x8x8x64xf32, #tpu.memory_space<vmem>>, vector<1x1x3x64xf32>
    %26 = arith.maximumf %24, %25 : vector<1x1x3x64xf32>
    %c0_55 = arith.constant 0 : index
    %c7_56 = arith.constant 7 : index
    %c2_57 = arith.constant 2 : index
    %c0_58 = arith.constant 0 : index
    %27 = tpu.strided_load %arg1[%c0_55, %c7_56, %c2_57, %c0_58] {strides = array<i32: 1, 2, 2, 1>} : memref<1x8x8x64xf32, #tpu.memory_space<vmem>>, vector<1x1x3x64xf32>
    %28 = arith.maximumf %26, %27 : vector<1x1x3x64xf32>
    %c0_59 = arith.constant 0 : index
    %c3 = arith.constant 3 : index
    %c0_60 = arith.constant 0 : index
    %c0_61 = arith.constant 0 : index
    %29 = vector.load %arg2[%c0_59, %c3, %c0_60, %c0_61] : memref<1x4x4x64xf32, #tpu.memory_space<vmem>>, vector<1x1x3x64xf32>
    tpu.vector_store %arg2[%c0_59, %c3, %c0_60, %c0_61], %28 {strides = array<i32>} : memref<1x4x4x64xf32, #tpu.memory_space<vmem>>, vector<1x1x3x64xf32>,
    %c0_62 = arith.constant 0 : index
    %c0_63 = arith.constant 0 : index
    %c6_64 = arith.constant 6 : index
    %c0_65 = arith.constant 0 : index
    %30 = tpu.strided_load %arg1[%c0_62, %c0_63, %c6_64, %c0_65] {strides = array<i32: 1, 2, 2, 1>} : memref<1x8x8x64xf32, #tpu.memory_space<vmem>>, vector<1x3x1x64xf32>
    %c0_66 = arith.constant 0 : index
    %c0_67 = arith.constant 0 : index
    %c7_68 = arith.constant 7 : index
    %c0_69 = arith.constant 0 : index
    %31 = tpu.strided_load %arg1[%c0_66, %c0_67, %c7_68, %c0_69] {strides = array<i32: 1, 2, 2, 1>} : memref<1x8x8x64xf32, #tpu.memory_space<vmem>>, vector<1x3x1x64xf32>
    %32 = arith.maximumf %30, %31 : vector<1x3x1x64xf32>
    %c0_70 = arith.constant 0 : index
    %c1_71 = arith.constant 1 : index
    %c6_72 = arith.constant 6 : index
    %c0_73 = arith.constant 0 : index
    %33 = tpu.strided_load %arg1[%c0_70, %c1_71, %c6_72, %c0_73] {strides = array<i32: 1, 2, 2, 1>} : memref<1x8x8x64xf32, #tpu.memory_space<vmem>>, vector<1x3x1x64xf32>
    %34 = arith.maximumf %32, %33 : vector<1x3x1x64xf32>
    %c0_74 = arith.constant 0 : index
    %c1_75 = arith.constant 1 : index
    %c7_76 = arith.constant 7 : index
    %c0_77 = arith.constant 0 : index
    %35 = tpu.strided_load %arg1[%c0_74, %c1_75, %c7_76, %c0_77] {strides = array<i32: 1, 2, 2, 1>} : memref<1x8x8x64xf32, #tpu.memory_space<vmem>>, vector<1x3x1x64xf32>
    %36 = arith.maximumf %34, %35 : vector<1x3x1x64xf32>
    %c0_78 = arith.constant 0 : index
    %c2_79 = arith.constant 2 : index
    %c6_80 = arith.constant 6 : index
    %c0_81 = arith.constant 0 : index
    %37 = tpu.strided_load %arg1[%c0_78, %c2_79, %c6_80, %c0_81] {strides = array<i32: 1, 2, 2, 1>} : memref<1x8x8x64xf32, #tpu.memory_space<vmem>>, vector<1x3x1x64xf32>
    %38 = arith.maximumf %36, %37 : vector<1x3x1x64xf32>
    %c0_82 = arith.constant 0 : index
    %c2_83 = arith.constant 2 : index
    %c7_84 = arith.constant 7 : index
    %c0_85 = arith.constant 0 : index
    %39 = tpu.strided_load %arg1[%c0_82, %c2_83, %c7_84, %c0_85] {strides = array<i32: 1, 2, 2, 1>} : memref<1x8x8x64xf32, #tpu.memory_space<vmem>>, vector<1x3x1x64xf32>
    %40 = arith.maximumf %38, %39 : vector<1x3x1x64xf32>
    %c0_86 = arith.constant 0 : index
    %c0_87 = arith.constant 0 : index
    %c3_88 = arith.constant 3 : index
    %c0_89 = arith.constant 0 : index
    %41 = vector.load %arg2[%c0_86, %c0_87, %c3_88, %c0_89] : memref<1x4x4x64xf32, #tpu.memory_space<vmem>>, vector<1x3x1x64xf32>
    tpu.vector_store %arg2[%c0_86, %c0_87, %c3_88, %c0_89], %40 {strides = array<i32>} : memref<1x4x4x64xf32, #tpu.memory_space<vmem>>, vector<1x3x1x64xf32>,
    %c0_90 = arith.constant 0 : index
    %c6_91 = arith.constant 6 : index
    %c6_92 = arith.constant 6 : index
    %c0_93 = arith.constant 0 : index
    %42 = tpu.strided_load %arg1[%c0_90, %c6_91, %c6_92, %c0_93] {strides = array<i32: 1, 2, 2, 1>} : memref<1x8x8x64xf32, #tpu.memory_space<vmem>>, vector<1x1x1x64xf32>
    %c0_94 = arith.constant 0 : index
    %c6_95 = arith.constant 6 : index
    %c7_96 = arith.constant 7 : index
    %c0_97 = arith.constant 0 : index
    %43 = tpu.strided_load %arg1[%c0_94, %c6_95, %c7_96, %c0_97] {strides = array<i32: 1, 2, 2, 1>} : memref<1x8x8x64xf32, #tpu.memory_space<vmem>>, vector<1x1x1x64xf32>
    %44 = arith.maximumf %42, %43 : vector<1x1x1x64xf32>
    %c0_98 = arith.constant 0 : index
    %c7_99 = arith.constant 7 : index
    %c6_100 = arith.constant 6 : index
    %c0_101 = arith.constant 0 : index
    %45 = tpu.strided_load %arg1[%c0_98, %c7_99, %c6_100, %c0_101] {strides = array<i32: 1, 2, 2, 1>} : memref<1x8x8x64xf32, #tpu.memory_space<vmem>>, vector<1x1x1x64xf32>
    %46 = arith.maximumf %44, %45 : vector<1x1x1x64xf32>
    %c0_102 = arith.constant 0 : index
    %c7_103 = arith.constant 7 : index
    %c7_104 = arith.constant 7 : index
    %c0_105 = arith.constant 0 : index
    %47 = tpu.strided_load %arg1[%c0_102, %c7_103, %c7_104, %c0_105] {strides = array<i32: 1, 2, 2, 1>} : memref<1x8x8x64xf32, #tpu.memory_space<vmem>>, vector<1x1x1x64xf32>
    %48 = arith.maximumf %46, %47 : vector<1x1x1x64xf32>
    %c0_106 = arith.constant 0 : index
    %c3_107 = arith.constant 3 : index
    %c3_108 = arith.constant 3 : index
    %c0_109 = arith.constant 0 : index
    %49 = vector.load %arg2[%c0_106, %c3_107, %c3_108, %c0_109] : memref<1x4x4x64xf32, #tpu.memory_space<vmem>>, vector<1x1x1x64xf32>
    tpu.vector_store %arg2[%c0_106, %c3_107, %c3_108, %c0_109], %48 {strides = array<i32>} : memref<1x4x4x64xf32, #tpu.memory_space<vmem>>, vector<1x1x1x64xf32>,
    return
  }
  func.func @transform_0(%arg0: i32) -> (i32, i32, i32, i32) {
    %c0_i32 = arith.constant 0 : i32
    %c0_i32_0 = arith.constant 0 : i32
    %c0_i32_1 = arith.constant 0 : i32
    %c0_i32_2 = arith.constant 0 : i32
    return %arg0, %c0_i32, %c0_i32_0, %c0_i32_1 : i32, i32, i32, i32
  }
  func.func @transform_1(%arg0: i32) -> (i32, i32, i32, i32) {
    %c0_i32 = arith.constant 0 : i32
    %c0_i32_0 = arith.constant 0 : i32
    %c0_i32_1 = arith.constant 0 : i32
    %c0_i32_2 = arith.constant 0 : i32
    return %arg0, %c0_i32, %c0_i32_0, %c0_i32_1 : i32, i32, i32, i32
  }
}

</mosaic_0001>

<bundles_post_ra>
// kernel: base_stem_forward.3
= control target key start
LH: loop header
LB: loop body
LE: loop exit
PB: predicated region body
PF: predicated region fallthrough
CT: control target
= control target key end

     0   :  { %6 = vsyncpa [#allocation3], 0  ;;  %s768_s0 = inlined_call_operand.vmem [shape: f32[2,8,8,64], index: 0, kind: input, shape index: {}]   ;;  %s769_s1 = inlined_call_operand.hbm [shape: f32[2,4,4,64], index: 1, kind: output, shape index: {}]  }
   0x1   :  { %8 = vsyncpa [#allocation3 + $0x1], 0  ;;  %s582_s6 = smov 0   ;;  %s584_s7 = smov 0  }
   0x2   :  { %s586_s8 = smov 0   ;;  %s588_s9 = smov 0  }
   0x3 LB: > { %s603_s10 = sadd.s32 4294967295, %s567_s9   ;;  %s394_s11 = sadd.s32 4294967294, %s567_s9   ;;  %s567_s9 = sphi %s588_s9, %s775_s9   ;;  %s563_s8 = sphi %s586_s8, %s774_s8   ;;  %s559_s7 = sphi %s584_s7, %s773_s7   ;;  %s555_s6 = sphi %s582_s6, %s772_s6  }
   0x4   : > { %s607_s12 = sadd.s32 1, %s567_s9   ;;  %s47_s13 = sadd.s32 1, %s563_s8 }
   0x5   : > { %s44_s14 = ssub.s32 %s567_s9, %s607_s12  ;;  %p57_p0 = scmp.ne.s32.totalorder %s563_s8, %s559_s7 }
   0x6   : > { %p45_p1 = scmp.eq.s32.totalorder %s44_s14, 0  ;;  %p58_p2 = scmp.eq.s32.totalorder %s603_s10, 1 }
   0x7   : > { %p63_p3 = scmp.ne.s32.totalorder %s559_s7, %s555_s6  ;;  %p64_p4 = scmp.eq.s32.totalorder %s394_s11, 1 }
   0x8   : > { %s618_s15 = scalar_select %p45_p1, %s563_s8, %s47_s13  }
   0x9   : > { %p620_p5 = por %p58_p2, %p57_p0  ;;  %p624_p6 = por %p64_p4, %p63_p3 }
   0xa   : > { %p397_p7 = scmp.ge.s32.totalorder %s567_s9, 1  ;;  %p90_p8 = scmp.lt.s32.totalorder %s567_s9, 3 }
   0xc   : > { %p91_p9 = pnand %p397_p7, %p90_p8 }
   0xd   : > { %p110_p10 = scmp.lt.s32.totalorder (!%p91_p9), %s603_s10, 1  ;;  %s107_s20 = sand.u32 (!%p91_p9), 1, %s559_s7   ;;  %vm192_vm0 = vcmask (!%p91_p9), 518144   ;;  %vm266_vm1 = vcmask (!%p91_p9), 516096  }
   0xe   : > { %94 = sbr.rel (%p91_p9) target bundleno = 74 (0x4a), region = 24  ;;  %s644_s24 = sshll.u32 (!%p91_p9), %s107_s20, 4 }
   0xf   : > { %s673_s25 = scalar_lea.vmem (!%p91_p9), [#allocation2], %s644_s24  ;;  %s463_s27 = sshll.u32 (!%p91_p9), %s603_s10, 8 }
  0x10   : > { %s296_s26 = sshll.u32 (!%p91_p9), %s673_s25, 4  ;;  %s719_s30 = scalar_lea.hbm (!%p91_p9), %s769_s1, %s463_s27  ;;  %s712_s26 = int_to_ptr.vmem [resolvable:$true] %s296_s26 }
  0x11   : > { %s727_s2 = scalar_lea.sflag (!%p91_p9), [#allocation3], %s107_s20  ;;  %s505_s3 = scalar_lea.vmem (!%p91_p9), %s712_s26, 256 }
  0x12   : > { %p506_p11 = scmp.ne.s32.totalorder (!%p91_p9), %s712_s26, %s505_s3  ;;  %s569_s4 = smov (!%p91_p9), [#allocation2]  }
  0x13   : > { %s509_s5 = sshll.u32 (!%p91_p9), %s569_s4, 4  ;;  %s510_s5 = int_to_ptr.vmem [resolvable:$false] %s509_s5 }
  0x14   : > { %p507_p12 = pnand (!%p91_p9), %p506_p11, %p620_p5  ;;  %p512_p0 = scmp.lt.s32.totalorder (!%p91_p9), %s712_s26, %s510_s5 }
  0x15   : > { %s111_s18 = scalar_select %p110_p10, %s603_s10, 1 }
  0x16   : > { %p508_p13 = pneg %p507_p12  ;;  %s511_s10 = scalar_lea.vmem %s510_s5, 512 }
  0x17   : > { %s462_s19 = sshll.u32 %s111_s18, 6  ;;  %p513_p1 = scmp.lt.s32.totalorder %s511_s10, %s505_s3 }
  0x18   : > { %s636_s23 = scalar_lea.vmem %s768_s0, %s462_s19 }
  0x19   : > { %v115_v0 = vld [vmem:[%s636_s23] ss:$2 sm:$0x7]  ;;  %v403_v1 = vld [vmem:[%s636_s23 + $0x1] ss:$2 sm:$0x7]  ;;  %p514_p2 = por %p513_p1, %p512_p0 }
  0x1a   : > { %v126_v2 = vmax.f32 %v115_v0, %v403_v1  ;;  %v406_v3 = vld [vmem:[%s636_s23 + $0x2] ss:$2 sm:$0x7]  ;;  %v409_v4 = vld [vmem:[%s636_s23 + $0x8] ss:$2 sm:$0x7] }
  0x1b   : > { %v412_v6 = vld [vmem:[%s636_s23 + $0x9] ss:$2 sm:$0x7]  ;;  %v401_v7 = vld [vmem:[%s636_s23 + $0x10] ss:$2 sm:$0x7]  ;;  %p515_p3 = pnand %p514_p2, %p508_p13 }
  0x1c   : > { %v135_v5 = vmax.f32 %v126_v2, %v406_v3  ;;  %v404_v9 = vld [vmem:[%s636_s23 + $0x11] ss:$2 sm:$0x7]  ;;  %v407_v10 = vld [vmem:[%s636_s23 + $0x12] ss:$2 sm:$0x7] }
  0x1d   : > { %v415_v11 = vld [vmem:[%s636_s23 + $0xa] ss:$2 sm:$0x7]  ;;  %v127_v12 = vmax.f32 %v401_v7, %v404_v9  ;;  %v410_v14 = vld [vmem:[%s636_s23 + $0x18] ss:$2 sm:$0x7] }
  0x1e   : > { %v144_v8 = vmax.f32 %v135_v5, %v409_v4  ;;  %v418_v15 = vld [vmem:[%s636_s23 + $0x10] ss:$2 sm:$0x7]  ;;  %v413_v17 = vld [vmem:[%s636_s23 + $0x19] ss:$2 sm:$0x7] }
  0x1f   : > { %v136_v16 = vmax.f32 %v127_v12, %v407_v10  ;;  %v402_v19 = vld [vmem:[%s636_s23 + $0x20] ss:$2 sm:$0x7]  ;;  %v405_v20 = vld [vmem:[%s636_s23 + $0x21] ss:$2 sm:$0x7] }
  0x20   : > { %v153_v13 = vmax.f32 %v144_v8, %v412_v6  ;;  %v421_v21 = vld [vmem:[%s636_s23 + $0x11] ss:$2 sm:$0x7]  ;;  %v128_v23 = vmax.f32 %v402_v19, %v405_v20  ;;  %v408_v24 = vld [vmem:[%s636_s23 + $0x22] ss:$2 sm:$0x7] }
  0x21   : > { %v145_v22 = vmax.f32 %v136_v16, %v410_v14  ;;  %v416_v26 = vld [vmem:[%s636_s23 + $0x1a] ss:$2 sm:$0x7]  ;;  %v411_v27 = vld [vmem:[%s636_s23 + $0x28] ss:$2 sm:$0x7] }
  0x22   : > { %v162_v18 = vmax.f32 %v153_v13, %v415_v11  ;;  %v424_v28 = vld [vmem:[%s636_s23 + $0x12] ss:$2 sm:$0x7]  ;;  %v419_v30 = vld [vmem:[%s636_s23 + $0x20] ss:$2 sm:$0x7]  ;;  %v137_v31 = vmax.f32 %v128_v23, %v408_v24 }
  0x23   : > { %v154_v29 = vmax.f32 %v145_v22, %v413_v17  ;;  %v422_v33 = vld [vmem:[%s636_s23 + $0x21] ss:$2 sm:$0x7]  ;;  %v414_v34 = vld [vmem:[%s636_s23 + $0x29] ss:$2 sm:$0x7] }
  0x24   : > { %v171_v25 = vmax.f32 %v162_v18, %v418_v15  ;;  %v427_v35 = vld [vmem:[%s636_s23 + $0x30] ss:$2 sm:$0x7]  ;;  %v146_v37 = vmax.f32 %v137_v31, %v411_v27  ;;  %v428_v38 = vld [vmem:[%s636_s23 + $0x31] ss:$2 sm:$0x7] }
  0x25   : > { %v163_v36 = vmax.f32 %v154_v29, %v416_v26  ;;  %v429_v39 = vld [vmem:[%s636_s23 + $0x32] ss:$2 sm:$0x7]  ;;  %v425_v41 = vld [vmem:[%s636_s23 + $0x22] ss:$2 sm:$0x7]  ;;  %v200_v44 = vmax.f32 %v427_v35, %v428_v38 }
  0x26   : > { %v180_v32 = vmax.f32 %v171_v25, %v421_v21  ;;  %v417_v42 = vld [vmem:[%s636_s23 + $0x2a] ss:$2 sm:$0x7]  ;;  %v420_v43 = vld [vmem:[%s636_s23 + $0x30] ss:$2 sm:$0x7]  ;;  %v155_v46 = vmax.f32 %v146_v37, %v414_v34 }
  0x27   : > { %v172_v45 = vmax.f32 %v163_v36, %v419_v30  ;;  %v430_v47 = vld [vmem:[%s636_s23 + $0x38] ss:$2 sm:$0x7]  ;;  %v434_v48 = vld [vmem:[%s636_s23 + $0x6] ss:$2 sm:$0x1]  ;;  %v203_v50 = vmax.f32 %v200_v44, %v429_v39 }
  0x28   : > { %v189_v40 = vmax.f32 %v180_v32, %v424_v28  ;;  %v423_v49 = vld [vmem:[%s636_s23 + $0x31] ss:$2 sm:$0x7]  ;;  %v437_v51 = vld [vmem:[%s636_s23 + $0x7] ss:$2 sm:$0x1]  ;;  %v164_v54 = vmax.f32 %v155_v46, %v417_v42 }
  0x29   : > { %v440_v52 = vld [vmem:[%s636_s23 + $0xe] ss:$2 sm:$0x1]  ;;  %v181_v53 = vmax.f32 %v172_v45, %v422_v33  ;;  %v431_v55 = vld [vmem:[%s636_s23 + $0x39] ss:$2 sm:$0x7]  ;;  %v227_v57 = vmax.f32 %v434_v48, %v437_v51  ;;  %v206_v59 = vmax.f32 %v203_v50, %v430_v47 }
  0x2a   : > { %193 = vst.msk [vmem:[%s673_s25] sm:$0x7] %vm192_vm0, %v189_v40  ;;  %v432_v56 = vld [vmem:[%s636_s23 + $0x3a] ss:$2 sm:$0x7]  ;;  %v173_v63 = vmax.f32 %v164_v54, %v420_v43 }
  0x2b   : > { %v426_v58 = vld [vmem:[%s636_s23 + $0x32] ss:$2 sm:$0x7]  ;;  %v443_v60 = vld [vmem:[%s636_s23 + $0xf] ss:$2 sm:$0x1]  ;;  %v190_v62 = vmax.f32 %v181_v53, %v425_v41  ;;  %v236_v0 = vmax.f32 %v227_v57, %v440_v52  ;;  %v209_v3 = vmax.f32 %v206_v59, %v431_v55 }
  0x2c   : > { %v435_v61 = vld [vmem:[%s636_s23 + $0x16] ss:$2 sm:$0x1]  ;;  %v438_v1 = vld [vmem:[%s636_s23 + $0x17] ss:$2 sm:$0x1]  ;;  %v182_v7 = vmax.f32 %v173_v63, %v423_v49 }
  0x2d   : > { %v441_v2 = vld [vmem:[%s636_s23 + $0x1e] ss:$2 sm:$0x1]  ;;  %v446_v4 = vld [vmem:[%s636_s23 + $0x16] ss:$2 sm:$0x1]  ;;  %v228_v6 = vmax.f32 %v435_v61, %v438_v1  ;;  %v245_v8 = vmax.f32 %v236_v0, %v443_v60  ;;  %v212_v11 = vmax.f32 %v209_v3, %v432_v56 }
  0x2e   : > { %v449_v5 = vld [vmem:[%s636_s23 + $0x17] ss:$2 sm:$0x1]  ;;  %194 = vst.msk [vmem:[%s673_s25 + $0x4] sm:$0x7] %vm192_vm0, %v190_v62  ;;  %v191_v15 = vmax.f32 %v182_v7, %v426_v58 }
  0x2f   : > { %v444_v9 = vld [vmem:[%s636_s23 + $0x1f] ss:$2 sm:$0x1]  ;;  %v436_v10 = vld [vmem:[%s636_s23 + $0x26] ss:$2 sm:$0x1]  ;;  %v237_v12 = vmax.f32 %v228_v6, %v441_v2  ;;  %v254_v16 = vmax.f32 %v245_v8, %v446_v4 }
  0x30   : > { %v439_v13 = vld [vmem:[%s636_s23 + $0x27] ss:$2 sm:$0x1]  ;;  %v442_v14 = vld [vmem:[%s636_s23 + $0x2e] ss:$2 sm:$0x1] }
  0x31   : > { %v447_v17 = vld [vmem:[%s636_s23 + $0x26] ss:$2 sm:$0x1]  ;;  %v450_v18 = vld [vmem:[%s636_s23 + $0x27] ss:$2 sm:$0x1]  ;;  %v229_v19 = vmax.f32 %v436_v10, %v439_v13  ;;  %v246_v20 = vmax.f32 %v237_v12, %v444_v9  ;;  %v263_v23 = vmax.f32 %v254_v16, %v449_v5 }
  0x32   : > { %433 = vst.msk [vmem:[%s673_s25 + $0xc] sm:$0x7] %vm192_vm0, %v212_v11  ;;  %v445_v21 = vld [vmem:[%s636_s23 + $0x2f] ss:$2 sm:$0x1] }
  0x33   : > { %v452_v22 = vld [vmem:[%s636_s23 + $0x36] ss:$2 sm:$0x1]  ;;  %195 = vst.msk [vmem:[%s673_s25 + $0x8] sm:$0x7] %vm192_vm0, %v191_v15  ;;  %v238_v24 = vmax.f32 %v229_v19, %v442_v14  ;;  %v255_v27 = vmax.f32 %v246_v20, %v447_v17 }
  0x34   : > { %v453_v25 = vld [vmem:[%s636_s23 + $0x37] ss:$2 sm:$0x1]  ;;  %v454_v26 = vld [vmem:[%s636_s23 + $0x3e] ss:$2 sm:$0x1] }
  0x35   : > { %v448_v28 = vld [vmem:[%s636_s23 + $0x36] ss:$2 sm:$0x1]  ;;  %v274_v29 = vmax.f32 %v452_v22, %v453_v25  ;;  %267 = vst.msk [vmem:[%s673_s25 + $0x3] sm:$0x1] %vm266_vm1, %v263_v23  ;;  %v247_v30 = vmax.f32 %v238_v24, %v445_v21  ;;  %v264_v32 = vmax.f32 %v255_v27, %v450_v18 }
  0x36   : > { %v455_v31 = vld [vmem:[%s636_s23 + $0x3f] ss:$2 sm:$0x1]  ;;  %v451_v33 = vld [vmem:[%s636_s23 + $0x37] ss:$2 sm:$0x1] }
  0x37   : > { %v277_v34 = vmax.f32 %v274_v29, %v454_v26  ;;  %v256_v35 = vmax.f32 %v247_v30, %v448_v28  ;;  %268 = vst.msk [vmem:[%s673_s25 + $0x7] sm:$0x1] %vm266_vm1, %v264_v32 }
  0x39   : > { %v280_v36 = vmax.f32 %v277_v34, %v455_v31  ;;  %v265_v37 = vmax.f32 %v256_v35, %v451_v33 }
  0x3b   : > { %456 = vst.msk [vmem:[%s673_s25 + $0xf] sm:$0x1] %vm266_vm1, %v280_v36  ;;  %269 = vst.msk [vmem:[%s673_s25 + $0xb] sm:$0x1] %vm266_vm1, %v265_v37 }
  0x3c   : > { %518 = shalt.err (!%p515_p3)
}
  0x3d   : > { %s519_s11 = scalar_lea.hbm %s719_s30, 256  ;;  %s523_s18 = scalar_lea.hbm %s769_s1, 512 }
  0x3e   : > { %p520_p4 = scmp.ne.s32.totalorder %s719_s30, %s519_s11  ;;  %p524_p9 = scmp.lt.u32.totalorder %s719_s30, %s769_s1 }
  0x3f   : > { %p525_p10 = scmp.lt.u32.totalorder %s523_s18, %s519_s11  ;;  %p527_p12 = scmp.lt.u32.totalorder %s519_s11, %s719_s30 }
  0x40   : > { %p521_p7 = pnand %p520_p4, %p620_p5 }
  0x41   : > { %p526_p11 = por %p525_p10, %p524_p9 }
  0x42   : > { %p522_p8 = pneg %p521_p7 }
  0x43   : > { %p528_p13 = por %p527_p12, %p526_p11 }
  0x45   : > { %p529_p0 = pnand %p528_p13, %p522_p8 }
  0x47   : > { %532 = shalt.err (!%p529_p0)
}
  0x48   : > { %s570_s21 = smov 64   ;;  %s571_s22 = smov 4  }
  0x49   : > { %464 = dma.vmem_to_hbm [thread:$0]  (%p620_p5), %s712_s26, 256, %s719_s30, %s727_s2, %s570_s21, %s570_s21, %s571_s22  }
  0x4a PF: > { %p470_p1 = scmp.ge.s32.totalorder %s567_s9, 2  ;;  %s311_s23 = sand.u32 1, %s555_s6  }
  0x4b   : > { %s312_s24 = scalar_lea.sflag [#allocation3], %s311_s23 }
  0x4c   : > { %p467_p2 = pnand %p470_p1, %p624_p6 }
  0x4e   : > { %550 = dma.done.wait (!%p467_p2), %s312_s24, 256  }
  0x4f   : > { %552 = vsyncadd (!%p467_p2), %s312_s24, 4294967040  ;;  %p11_p3 = scmp.ge.s32.totalorder %s607_s12, 4   ;;  %s772_s6 = smov %s559_s7 }
  0x50   : > { %s773_s7 = smov %s563_s8  ;;  %s774_s8 = smov %s618_s15 }
  0x51   : > { %s775_s9 = smov %s607_s12  ;;  %13 = sbr.rel (!%p11_p3) target bundleno = 3 (0x3), region = 114 }
  0x58   :  { %317 = vsyncpa [#allocation3], 1 }
  0x59   :  { %319 = vsyncpa [#allocation3 + $0x1], 1 }

// kernel: base_stem_forward.2
= control target key start
LH: loop header
LB: loop body
LE: loop exit
PB: predicated region body
PF: predicated region fallthrough
CT: control target
= control target key end

     0   :  { %v486_v0 = vmov 0   ;;  %vm182_vm0 = vcmask 154624   ;;  %vm207_vm1 = vcmask 1040384   ;;  %vm208_vm2 = vcmask 1041408   ;;  %s705_s1 = inlined_call_operand.vmem [shape: bf16[147,64], index: 1, kind: input, shape index: {}]   ;;  %s706_s0 = inlined_call_operand.vmem [shape: bf16[128,147], index: 0, kind: input, shape index: {}]   ;;  %s707_s2 = inlined_call_operand.vmem [shape: f32[1,64], index: 2, kind: input, shape index: {}]   ;;  %s708_s3 = inlined_call_operand.vmem [shape: f32[1,64], index: 3, kind: input, shape index: {}]   ;;  %s709_s4 = inlined_call_operand.vmem [shape: f32[128,64], index: 4, kind: output, shape index: {}]  }
   0x1   :  { %214 = vmatprep.subr.bf16.mxu0 %v486_v0  ;;  %430 = vmatprep.subr.bf16.mxu1 %v486_v0  ;;  %v452_v1 = vld [vmem:[%s705_s1] sm:$0xff]   ;;  %v453_v2 = vld [vmem:[%s705_s1 + $0x8] sm:$0xff]   ;;  %v454_v3 = vld [vmem:[%s705_s1 + $0x10] sm:$0xff]   ;;  %v487_v11 = vmov 65535   ;;  %vm373_vm3 = vcmask 523264  }
   0x2   :  { %215 = vmatpush1.bf16.msra.mxu0 %v452_v1  ;;  %440 = vmatpush1.bf16.msra.mxu1 %v452_v1  ;;  %v455_v4 = vld [vmem:[%s705_s1 + $0x18] sm:$0xff]   ;;  %v464_v5 = vld [vmem:[%s706_s0 + $0x4] ss:$8 sps:$4 sm:$0xff]   ;;  %v458_v9 = vld [vmem:[%s705_s1 + $0x30] sm:$0xff]   ;;  %v209_v12 = vsel %vm207_vm1, 4294967295, %v487_v11 }
   0x3   :  { %216 = vmatprep.subr.bf16.mxu0 %v486_v0  ;;  %431 = vmatprep.subr.bf16.mxu1 %v486_v0  ;;  %v467_v6 = vld [vmem:[%s706_s0 + $0x44] ss:$8 sps:$4 sm:$0xff]   ;;  %v459_v10 = vld [vmem:[%s705_s1 + $0x38] sm:$0xff]   ;;  %v461_v14 = vld [vmem:[%s705_s1 + $0x48] ss:$0 sps:$4 sm:$0x33]  }
   0x4   :  { %420 = vmatprep.mubr.msk.bf16.mxu0 %vm182_vm0, %v464_v5  ;;  %v456_v7 = vld [vmem:[%s705_s1 + $0x20] sm:$0xff]   ;;  %424 = vmatprep.mubr.msk.bf16.mxu1 %vm182_vm0, %v467_v6  ;;  %v457_v8 = vld [vmem:[%s705_s1 + $0x28] sm:$0xff]   ;;  %v210_v15 = vsel %vm208_vm2, %v209_v12, 0  ;;  %v468_v19 = vld [vmem:[%s706_s0 + $0x14] ss:$8 sps:$4 sm:$0xff]  }
   0x5   :  { %v460_v13 = vld [vmem:[%s705_s1 + $0x40] sm:$0xff]   ;;  %v212_v16 = vand.u32 %v461_v14, %v210_v15  ;;  %v470_v20 = vld [vmem:[%s706_s0 + $0x54] ss:$8 sps:$4 sm:$0xff]   ;;  %v472_v21 = vld [vmem:[%s706_s0 + $0x10] ss:$8 sps:$4 sm:$0xff]  }
   0x6   :  { %217 = vmatpush1.bf16.msra.mxu0 %v453_v2  ;;  %441 = vmatpush1.bf16.msra.mxu1 %v453_v2  ;;  %v462_v17 = vld [vmem:[%s706_s0] ss:$8 sps:$4 sm:$0xff]   ;;  %v473_v22 = vld [vmem:[%s706_s0 + $0x50] ss:$8 sps:$4 sm:$0xff]   ;;  %v474_v23 = vld [vmem:[%s706_s0 + $0x24] ss:$8 sps:$4 sm:$0xff]  }
   0x7   :  { %218 = vmatprep.subr.bf16.mxu0 %v486_v0  ;;  %432 = vmatprep.subr.bf16.mxu1 %v486_v0  ;;  %v465_v18 = vld [vmem:[%s706_s0 + $0x40] ss:$8 sps:$4 sm:$0xff]   ;;  %v476_v24 = vld [vmem:[%s706_s0 + $0x64] ss:$8 sps:$4 sm:$0xff]   ;;  %v480_v27 = vld [vmem:[%s706_s0 + $0x34] ss:$8 sps:$4 sm:$0xff]  }
   0x8   :  { %v478_v25 = vld [vmem:[%s706_s0 + $0x20] ss:$8 sps:$4 sm:$0xff]   ;;  %v482_v28 = vld [vmem:[%s706_s0 + $0x74] ss:$8 sps:$4 sm:$0xff]   ;;  %v484_v29 = vld [vmem:[%s706_s0 + $0x30] ss:$8 sps:$4 sm:$0xff]  }
   0x9   :  { %v479_v26 = vld [vmem:[%s706_s0 + $0x60] ss:$8 sps:$4 sm:$0xff]   ;;  %v485_v30 = vld [vmem:[%s706_s0 + $0x70] ss:$8 sps:$4 sm:$0xff]  }
   0xa   :  { %219 = vmatpush1.bf16.msra.mxu0 %v454_v3  ;;  %442 = vmatpush1.bf16.msra.mxu1 %v454_v3  ;;  %v602_v31 = vld [vmem:[%s707_s2] ss:$0 sm:$0xff] }
   0xb   :  { %220 = vmatprep.subr.bf16.mxu0 %v486_v0  ;;  %433 = vmatprep.subr.bf16.mxu1 %v486_v0  ;;  %v607_v33 = vld [vmem:[%s708_s3] ss:$0 sm:$0xff] }
   0xe   :  { %221 = vmatpush1.bf16.msra.mxu0 %v455_v4  ;;  %443 = vmatpush1.bf16.msra.mxu1 %v455_v4 }
   0xf   :  { %222 = vmatprep.subr.bf16.mxu0 %v486_v0  ;;  %434 = vmatprep.subr.bf16.mxu1 %v486_v0 }
  0x12   :  { %223 = vmatpush1.bf16.msra.mxu0 %v456_v7  ;;  %444 = vmatpush1.bf16.msra.mxu1 %v456_v7 }
  0x13   :  { %224 = vmatprep.subr.bf16.mxu0 %v486_v0  ;;  %435 = vmatprep.subr.bf16.mxu1 %v486_v0 }
  0x16   :  { %225 = vmatpush1.bf16.msra.mxu0 %v457_v8  ;;  %445 = vmatpush1.bf16.msra.mxu1 %v457_v8 }
  0x17   :  { %226 = vmatprep.subr.bf16.mxu0 %v486_v0  ;;  %436 = vmatprep.subr.bf16.mxu1 %v486_v0 }
  0x1a   :  { %227 = vmatpush1.bf16.msra.mxu0 %v458_v9  ;;  %446 = vmatpush1.bf16.msra.mxu1 %v458_v9 }
  0x1b   :  { %228 = vmatprep.subr.bf16.mxu0 %v486_v0  ;;  %437 = vmatprep.subr.bf16.mxu1 %v486_v0 }
  0x1e   :  { %229 = vmatpush1.bf16.msra.mxu0 %v459_v10  ;;  %447 = vmatpush1.bf16.msra.mxu1 %v459_v10 }
  0x1f   :  { %230 = vmatprep.subr.bf16.mxu0 %v486_v0  ;;  %438 = vmatprep.subr.bf16.mxu1 %v486_v0 }
  0x22   :  { %231 = vmatpush1.bf16.msra.mxu0 %v460_v13  ;;  %448 = vmatpush1.bf16.msra.mxu1 %v460_v13 }
  0x23   :  { %232 = vmatprep.subr.bf16.mxu0 %v486_v0  ;;  %439 = vmatprep.subr.bf16.mxu1 %v486_v0 }
  0x26   :  { %233 = vmatpush1.bf16.msra.mxu0 %v212_v16  ;;  %449 = vmatpush1.bf16.msra.mxu1 %v212_v16 }
  0x29   :  { %247 = vmatmul.mubr.bf16.vlgmr.msra.gmra.mrb[0].mxu0 %v462_v17  ;;  %279 = vmatmul.mubr.bf16.vlgmr.msra.gmra.mrb[0].mxu1 %v465_v18 }
  0x2a   :  { %421 = vmatprep.mubr.msk.bf16.mxu0 %vm182_vm0, %v468_v19  ;;  %425 = vmatprep.mubr.msk.bf16.mxu1 %vm182_vm0, %v470_v20 }
  0x31   :  { %255 = vmatmul.mubr.bf16.gmra.mrb[4].mxu0 %v472_v21  ;;  %287 = vmatmul.mubr.bf16.gmra.mrb[4].mxu1 %v473_v22 }
  0x32   :  { %422 = vmatprep.mubr.msk.bf16.mxu0 %vm182_vm0, %v474_v23  ;;  %426 = vmatprep.mubr.msk.bf16.mxu1 %vm182_vm0, %v476_v24 }
  0x39   :  { %263 = vmatmul.mubr.bf16.gmra.mrb[8].mxu0 %v478_v25  ;;  %295 = vmatmul.mubr.bf16.gmra.mrb[8].mxu1 %v479_v26 }
  0x3a   :  { %423 = vmatprep.mubr.msk.bf16.mxu0 %vm182_vm0, %v480_v27  ;;  %427 = vmatprep.mubr.msk.bf16.mxu1 %vm182_vm0, %v482_v28 }
  0x41   :  { %271 = vmatmul.mubr.bf16.gmra.mrb[12].mxu0 %v484_v29  ;;  %303 = vmatmul.mubr.bf16.gmra.mrb[12].mxu1 %v485_v30 }
  0xfc   :  { %v248_v32 = vpop.f32.mrb[0].mxu0  ;;  %v280_v34 = vpop.f32.mrb[0].mxu1 }
  0xfd   :  { %v318_v35 = vmul.f32 %v602_v31, %v248_v32  ;;  %v326_v36 = vmul.f32 %v602_v31, %v280_v34  ;;  %v250_v37 = vpop.f32.mrb[1].mxu0  ;;  %v282_v38 = vpop.f32.mrb[1].mxu1 }
  0xfe   :  { %v251_v39 = vpop.f32.mrb[2].mxu0  ;;  %v283_v40 = vpop.f32.mrb[2].mxu1 }
  0xff   :  { %v341_v41 = vadd.f32 %v607_v33, %v318_v35  ;;  %v349_v42 = vadd.f32 %v607_v33, %v326_v36  ;;  %v319_v43 = vmul.f32 %v602_v31, %v251_v39  ;;  %v327_v44 = vmul.f32 %v602_v31, %v283_v40  ;;  %v253_v45 = vpop.f32.mrb[3].mxu0  ;;  %v285_v46 = vpop.f32.mrb[3].mxu1 }
 0x101   :  { %v357_v47 = vmax.f32 %v341_v41, 0.0  ;;  %v365_v48 = vmax.f32 %v349_v42, 0.0  ;;  %v342_v49 = vadd.f32 %v607_v33, %v319_v43  ;;  %v350_v50 = vadd.f32 %v607_v33, %v327_v44 }
 0x103   :  { %374 = vst.msk [vmem:[%s709_s4] sm:$0xff] %vm373_vm3, %v357_v47  ;;  %382 = vst.msk [vmem:[%s709_s4 + $0x40] sm:$0xff] %vm373_vm3, %v365_v48  ;;  %v358_v51 = vmax.f32 %v342_v49, 0.0  ;;  %v366_v52 = vmax.f32 %v350_v50, 0.0 }
 0x104   :  { %v256_v53 = vpop.f32.mrb[4].mxu0  ;;  %v288_v54 = vpop.f32.mrb[4].mxu1 }
 0x105   :  { %375 = vst.msk [vmem:[%s709_s4 + $0x8] sm:$0xff] %vm373_vm3, %v358_v51  ;;  %383 = vst.msk [vmem:[%s709_s4 + $0x48] sm:$0xff] %vm373_vm3, %v366_v52  ;;  %v320_v55 = vmul.f32 %v602_v31, %v256_v53  ;;  %v328_v56 = vmul.f32 %v602_v31, %v288_v54  ;;  %v258_v57 = vpop.f32.mrb[5].mxu0  ;;  %v290_v58 = vpop.f32.mrb[5].mxu1 }
 0x106   :  { %v259_v59 = vpop.f32.mrb[6].mxu0  ;;  %v291_v60 = vpop.f32.mrb[6].mxu1 }
 0x107   :  { %v343_v61 = vadd.f32 %v607_v33, %v320_v55  ;;  %v351_v62 = vadd.f32 %v607_v33, %v328_v56  ;;  %v321_v63 = vmul.f32 %v602_v31, %v259_v59  ;;  %v329_v0 = vmul.f32 %v602_v31, %v291_v60  ;;  %v261_v1 = vpop.f32.mrb[7].mxu0  ;;  %v293_v2 = vpop.f32.mrb[7].mxu1 }
 0x109   :  { %v359_v3 = vmax.f32 %v343_v61, 0.0  ;;  %v367_v4 = vmax.f32 %v351_v62, 0.0  ;;  %v344_v5 = vadd.f32 %v607_v33, %v321_v63  ;;  %v352_v6 = vadd.f32 %v607_v33, %v329_v0 }
 0x10b   :  { %376 = vst.msk [vmem:[%s709_s4 + $0x10] sm:$0xff] %vm373_vm3, %v359_v3  ;;  %384 = vst.msk [vmem:[%s709_s4 + $0x50] sm:$0xff] %vm373_vm3, %v367_v4  ;;  %v360_v7 = vmax.f32 %v344_v5, 0.0  ;;  %v368_v8 = vmax.f32 %v352_v6, 0.0 }
 0x10c   :  { %v264_v9 = vpop.f32.mrb[8].mxu0  ;;  %v296_v10 = vpop.f32.mrb[8].mxu1 }
 0x10d   :  { %377 = vst.msk [vmem:[%s709_s4 + $0x18] sm:$0xff] %vm373_vm3, %v360_v7  ;;  %385 = vst.msk [vmem:[%s709_s4 + $0x58] sm:$0xff] %vm373_vm3, %v368_v8  ;;  %v322_v11 = vmul.f32 %v602_v31, %v264_v9  ;;  %v330_v12 = vmul.f32 %v602_v31, %v296_v10  ;;  %v266_v13 = vpop.f32.mrb[9].mxu0  ;;  %v298_v14 = vpop.f32.mrb[9].mxu1 }
 0x10e   :  { %v267_v15 = vpop.f32.mrb[10].mxu0  ;;  %v299_v16 = vpop.f32.mrb[10].mxu1 }
 0x10f   :  { %v345_v17 = vadd.f32 %v607_v33, %v322_v11  ;;  %v353_v18 = vadd.f32 %v607_v33, %v330_v12  ;;  %v323_v19 = vmul.f32 %v602_v31, %v267_v15  ;;  %v331_v20 = vmul.f32 %v602_v31, %v299_v16  ;;  %v269_v21 = vpop.f32.mrb[11].mxu0  ;;  %v301_v22 = vpop.f32.mrb[11].mxu1 }
 0x111   :  { %v361_v23 = vmax.f32 %v345_v17, 0.0  ;;  %v369_v24 = vmax.f32 %v353_v18, 0.0  ;;  %v346_v25 = vadd.f32 %v607_v33, %v323_v19  ;;  %v354_v26 = vadd.f32 %v607_v33, %v331_v20 }
 0x113   :  { %378 = vst.msk [vmem:[%s709_s4 + $0x20] sm:$0xff] %vm373_vm3, %v361_v23  ;;  %386 = vst.msk [vmem:[%s709_s4 + $0x60] sm:$0xff] %vm373_vm3, %v369_v24  ;;  %v362_v27 = vmax.f32 %v346_v25, 0.0  ;;  %v370_v28 = vmax.f32 %v354_v26, 0.0 }
 0x114   :  { %v272_v29 = vpop.f32.mrb[12].mxu0  ;;  %v304_v30 = vpop.f32.mrb[12].mxu1 }
 0x115   :  { %379 = vst.msk [vmem:[%s709_s4 + $0x28] sm:$0xff] %vm373_vm3, %v362_v27  ;;  %387 = vst.msk [vmem:[%s709_s4 + $0x68] sm:$0xff] %vm373_vm3, %v370_v28  ;;  %v324_v32 = vmul.f32 %v602_v31, %v272_v29  ;;  %v332_v34 = vmul.f32 %v602_v31, %v304_v30  ;;  %v274_v35 = vpop.f32.mrb[13].mxu0  ;;  %v306_v36 = vpop.f32.mrb[13].mxu1 }
 0x116   :  { %v275_v37 = vpop.f32.mrb[14].mxu0  ;;  %v307_v38 = vpop.f32.mrb[14].mxu1 }
 0x117   :  { %v347_v39 = vadd.f32 %v607_v33, %v324_v32  ;;  %v355_v40 = vadd.f32 %v607_v33, %v332_v34  ;;  %v325_v41 = vmul.f32 %v602_v31, %v275_v37  ;;  %v333_v42 = vmul.f32 %v602_v31, %v307_v38  ;;  %v277_v43 = vpop.f32.mrb[15].mxu0  ;;  %v309_v44 = vpop.f32.mrb[15].mxu1 }
 0x119   :  { %v363_v45 = vmax.f32 %v347_v39, 0.0  ;;  %v371_v46 = vmax.f32 %v355_v40, 0.0  ;;  %v348_v47 = vadd.f32 %v607_v33, %v325_v41  ;;  %v356_v48 = vadd.f32 %v607_v33, %v333_v42 }
 0x11b   :  { %380 = vst.msk [vmem:[%s709_s4 + $0x30] sm:$0xff] %vm373_vm3, %v363_v45  ;;  %388 = vst.msk [vmem:[%s709_s4 + $0x70] sm:$0xff] %vm373_vm3, %v371_v46  ;;  %v364_v49 = vmax.f32 %v348_v47, 0.0  ;;  %v372_v31 = vmax.f32 %v356_v48, 0.0 }
 0x11d   :  { %381 = vst.msk [vmem:[%s709_s4 + $0x38] sm:$0xff] %vm373_vm3, %v364_v49  ;;  %389 = vst.msk [vmem:[%s709_s4 + $0x78] sm:$0xff] %vm373_vm3, %v372_v31 }

</bundles_post_ra>
